<compile_context>
chip_gen: v5e
topology: v5e:2x2
jax: 0.10.0
libtpu: 0.0.40
codegen_flags: <defaults>
</compile_context>

<pallas_src>
import functools

import jax
import jax.numpy as jnp
from jax.experimental import pallas as pl
from jax.experimental.pallas import tpu as pltpu


def _transition_gru_kernel(h_ref, w_ref, b_ref, out_ref, pre_ref, *,
                           hidden, block_n):
    """Grid = (batch tile i, N tile j over the fused 3H gate dimension)."""
    j = pl.program_id(1)

    # Native (M,K)x(K,N) matmul on this N tile of the pre-transposed fused
    # weight.  h is only cast when bf16 weights are used: a cheap (tb,H) VPU
    # cast, never a cast of the whole weight block.  f32 accumulation.
    h_mm = h_ref[...].astype(w_ref.dtype)
    pre = jnp.dot(h_mm, w_ref[...], preferred_element_type=jnp.float32)
    pre = pre + b_ref[...].astype(jnp.float32)               # (tb, block_n)

    # Stash this tile of pre-activations; block_n is a multiple of 128 whenever
    # j can be nonzero, so the store is lane-aligned.
    col = pl.multiple_of(j * block_n, 128)
    pre_ref[:, pl.ds(col, block_n)] = pre

    # Gate epilogue once all 3H pre-activation columns are present.
    @pl.when(j == pl.num_programs(1) - 1)
    def _():
        H = hidden
        pre_all = pre_ref[...]                                # (tb, 3H) f32
        r = jax.nn.sigmoid(pre_all[:, 0:H])
        z = jax.nn.sigmoid(pre_all[:, H:2 * H])
        h_hat = jnp.tanh(r * pre_all[:, 2 * H:3 * H])
        h = h_ref[...].astype(jnp.float32)
        # (1 - z) * h + z * h_hat  ==  h + z * (h_hat - h)
        out_ref[...] = (h + z * (h_hat - h)).astype(out_ref.dtype)


def transition_gru_cell(h, w_r, b_r, w_z, b_z, w_h, b_h, *,
                        tb=None, weight_dtype=None,
                        max_weight_block_bytes=16 * 1024 * 1024):
    """TransitionGRUCell forward.

    h:   (B, H) activations (float32).
    w_*: (H, H) PyTorch (out, in)-layout Linear weights.  b_*: (H,).
    weight_dtype: HBM storage dtype for the fused weight (e.g. jnp.bfloat16 to
        halve the weight DMA; accumulation and epilogue stay f32).  None -> h.dtype.
    """
    B, H = h.shape
    w_dtype = jnp.dtype(weight_dtype) if weight_dtype is not None else jnp.dtype(h.dtype)
    act_itemsize = jnp.dtype(h.dtype).itemsize

    # Fused, PRE-TRANSPOSED weight (H, 3H) with column groups [r | z | h], plus
    # fused f32 bias.  The wrapper materializes a new array anyway, so the
    # transpose is free and loop-invariant w.r.t. any outer recurrence.
    w_fused = jnp.concatenate([w_r, w_z, w_h], axis=0).T.astype(w_dtype)    # (H, 3H)
    b_fused = jnp.concatenate([b_r, b_z, b_h], axis=0).reshape(1, 3 * H)    # f32

    # Batch tile: big tiles amortize MXU fill/drain.  Cap at 128 on v5-class
    # chips (128-wide MXU, 16 MiB default scoped VMEM), 256 on v6e/v7x.
    if tb is None:
        try:
            kind = jax.devices()[0].device_kind.lower()
        except Exception:
            kind = ""
        cap = 128 if "v5" in kind else 256
        tb = B if B <= cap else cap
    num_b = pl.cdiv(B, tb)

    # N tiling of the fused (H, 3H) weight: smallest tile count whose per-tile
    # weight block fits the budget while keeping block_n a multiple of 128.
    w_itemsize = w_dtype.itemsize
    num_n = 1
    if H % 128 == 0 and H * 3 * H * w_itemsize > max_weight_block_bytes:
        n128 = (3 * H) // 128
        num_n = n128
        for cand in range(1, n128 + 1):
            if n128 % cand == 0 and H * ((3 * H) // cand) * w_itemsize <= max_weight_block_bytes:
                num_n = cand
                break
    block_n = (3 * H) // num_n
    grid = (num_b, num_n)
    invariant = (num_n == 1)   # weight/bias blocks constant over the whole grid

    # Scoped-VMEM budget from the actual buffers (+50% headroom): weight block
    # (1 or 2 buffers) + double-buffered h/out tiles + (tb,3H) f32 scratch + bias.
    w_block_bytes = H * block_n * w_itemsize
    vmem_need = (w_block_bytes * (1 if invariant else 2)
                 + 2 * tb * H * act_itemsize          # h tiles
                 + 2 * tb * H * act_itemsize          # out tiles
                 + tb * 3 * H * 4                     # pre-activation scratch
                 + 2 * 3 * H * 4)                     # bias
    vmem_limit = int(min(96 * 1024 * 1024,
                         max(int(vmem_need * 1.5), 32 * 1024 * 1024)))

    cost = pl.CostEstimate(
        flops=2 * B * H * 3 * H,
        transcendentals=3 * B * H,                    # 2x sigmoid + 1x tanh
        bytes_accessed=int(w_fused.size) * w_itemsize
                       + int(b_fused.size) * 4
                       + 2 * B * H * act_itemsize,
    )

    kernel = functools.partial(_transition_gru_kernel, hidden=H, block_n=block_n)

    def build(single_buffer_invariant):
        wb_kwargs = {}
        if single_buffer_invariant:
            # Grid-invariant operands need only one VMEM buffer.
            wb_kwargs = dict(pipeline_mode=pl.Buffered(1))
        in_specs = [
            pl.BlockSpec((tb, H), lambda i, j: (i, 0)),                     # h (resident over j)
            pl.BlockSpec((H, block_n), lambda i, j: (0, j), **wb_kwargs),   # fused W^T tile
            pl.BlockSpec((1, block_n), lambda i, j: (0, j), **wb_kwargs),   # fused bias tile
        ]
        return pl.pallas_call(
            kernel,
            out_shape=jax.ShapeDtypeStruct((B, H), h.dtype),
            grid_spec=pltpu.PrefetchScalarGridSpec(
                num_scalar_prefetch=0,
                grid=grid,
                in_specs=in_specs,
                out_specs=pl.BlockSpec((tb, H), lambda i, j: (i, 0)),
                scratch_shapes=[pltpu.VMEM((tb, 3 * H), jnp.float32)],
            ),
            compiler_params=pltpu.CompilerParams(
                dimension_semantics=("parallel", "arbitrary"),
                vmem_limit_bytes=vmem_limit,
            ),
            cost_estimate=cost,
        )

    if invariant:
        try:
            return build(True)(h, w_fused, b_fused)
        except Exception:
            # pl.Buffered(1) unsupported by this jax/libtpu combo: fall back to
            # default double buffering (costs VMEM only, never correctness).
            pass
    return build(False)(h, w_fused, b_fused)


def transition_gru_ref(h, w_r, b_r, w_z, b_z, w_h, b_h):
    r = jax.nn.sigmoid(h @ w_r.T + b_r)
    z = jax.nn.sigmoid(h @ w_z.T + b_z)
    h_hat = jnp.tanh(r * (h @ w_h.T + b_h))
    return (1.0 - z) * h + z * h_hat


if __name__ == "__main__":
    B, H = 16, 128   # batch, hidden_size (H kept lane-aligned: H % 128 == 0)

    key = jax.random.PRNGKey(0)
    keys = jax.random.split(key, 7)
    bound = 1.0 / (H ** 0.5)     # PyTorch Linear-style uniform init bound
    w_r = jax.random.uniform(keys[0], (H, H), jnp.float32, -bound, bound)
    b_r = jax.random.uniform(keys[1], (H,), jnp.float32, -bound, bound)
    w_z = jax.random.uniform(keys[2], (H, H), jnp.float32, -bound, bound)
    b_z = jax.random.uniform(keys[3], (H,), jnp.float32, -bound, bound)
    w_h = jax.random.uniform(keys[4], (H, H), jnp.float32, -bound, bound)
    b_h = jax.random.uniform(keys[5], (H,), jnp.float32, -bound, bound)
    h_minus_one = jax.random.normal(keys[6], (B, H), jnp.float32)

    ref = transition_gru_ref(h_minus_one, w_r, b_r, w_z, b_z, w_h, b_h)

    # Default path: single N step, f32 weights, single-buffered invariants.
    out = transition_gru_cell(h_minus_one, w_r, b_r, w_z, b_z, w_h, b_h)
    out = jax.block_until_ready(out)
    assert out.shape == (B, H)
    assert jnp.allclose(out, ref, atol=1e-5, rtol=1e-5), "mismatch (single N tile)"

    # Exercise the large-H path at small shapes: a tiny weight-block budget
    # forces the (H, 3H) weight to be streamed in 3 N tiles with the scratch
    # accumulation + pl.when epilogue.
    out_tiled = transition_gru_cell(h_minus_one, w_r, b_r, w_z, b_z, w_h, b_h,
                                    max_weight_block_bytes=64 * 1024)
    out_tiled = jax.block_until_ready(out_tiled)
    assert jnp.allclose(out_tiled, ref, atol=1e-5, rtol=1e-5), "mismatch (3 N tiles)"

    print("KERNEL_OK")
</pallas_src>

<mosaic_0001>
module attributes {stable_mosaic.version = 11 : i64} {
  func.func @_transition_gru_kernel(%arg0: i32, %arg1: i32, %arg2: memref<16x128xf32, #tpu.memory_space<vmem>>, %arg3: memref<128x384xf32, #tpu.memory_space<vmem>>, %arg4: memref<1x384xf32, #tpu.memory_space<vmem>>, %arg5: memref<16x128xf32, #tpu.memory_space<vmem>>, %arg6: memref<16x384xf32, #tpu.memory_space<vmem>>) attributes {dimension_semantics = [#tpu.dimension_semantics<parallel>, #tpu.dimension_semantics<arbitrary>], iteration_bounds = array<i64: 1, 1>, scalar_prefetch = 0 : i64, scratch_operands = 1 : i64, tpu.core_type = #tpu.core_type<tc>, window_params = [{transform_indices = @transform_0, window_bounds = array<i64: 16, 128>}, {pipeline_mode = #tpu.pipeline_mode<synchronous>, transform_indices = @transform_1, window_bounds = array<i64: 128, 384>}, {pipeline_mode = #tpu.pipeline_mode<synchronous>, transform_indices = @transform_2, window_bounds = array<i64: 1, 384>}, {transform_indices = @transform_3, window_bounds = array<i64: 16, 128>}]} {
    %c0 = arith.constant 0 : index
    %c0_0 = arith.constant 0 : index
    %0 = vector.load %arg2[%c0, %c0_0] : memref<16x128xf32, #tpu.memory_space<vmem>>, vector<16x128xf32>
    %c0_1 = arith.constant 0 : index
    %c0_2 = arith.constant 0 : index
    %1 = vector.load %arg3[%c0_1, %c0_2] : memref<128x384xf32, #tpu.memory_space<vmem>>, vector<128x384xf32>
    %cst = arith.constant dense<0.000000e+00> : vector<16x384xf32>
    %2 = tpu.matmul %0, %1, %cst {dimension_numbers = #tpu.dot_dimension_numbers<[1], [0], [0], [1], [0, 0, 1, 1], [], []>} : vector<16x128xf32>, vector<128x384xf32>, vector<16x384xf32> -> vector<16x384xf32>
    %c0_3 = arith.constant 0 : index
    %c0_4 = arith.constant 0 : index
    %3 = vector.load %arg4[%c0_3, %c0_4] : memref<1x384xf32, #tpu.memory_space<vmem>>, vector<1x384xf32>
    %4 = vector.broadcast %3 : vector<1x384xf32> to vector<16x384xf32>
    %5 = arith.addf %2, %4 : vector<16x384xf32>
    %c384_i32 = arith.constant 384 : i32
    %6 = arith.muli %arg1, %c384_i32 : i32
    %7 = tpu.assume_multiple %6, 128 : i32
    %c0_5 = arith.constant 0 : index
    %8 = arith.index_cast %7 : i32 to index
    %9 = vector.load %arg6[%c0_5, %8] : memref<16x384xf32, #tpu.memory_space<vmem>>, vector<16x384xf32>
    tpu.vector_store %arg6[%c0_5, %8], %5 {strides = array<i32>} : memref<16x384xf32, #tpu.memory_space<vmem>>, vector<16x384xf32>,
    %c0_i32 = arith.constant 0 : i32
    %10 = arith.cmpi eq, %arg1, %c0_i32 : i32
    %11 = arith.extui %10 : i1 to i32
    %c0_i32_6 = arith.constant 0 : i32
    %12 = arith.cmpi ne, %11, %c0_i32_6 : i32
    scf.if %12 {
      %c0_7 = arith.constant 0 : index
      %c0_8 = arith.constant 0 : index
      %13 = vector.load %arg6[%c0_7, %c0_8] : memref<16x384xf32, #tpu.memory_space<vmem>>, vector<16x384xf32>
      %14 = vector.extract_strided_slice %13 {offsets = [0, 0], sizes = [16, 128], strides = [1, 1]} : vector<16x384xf32> to vector<16x128xf32>
      %15 = arith.negf %14 : vector<16x128xf32>
      %16 = math.exp %15 : vector<16x128xf32>
      %cst_9 = arith.constant 1.000000e+00 : f32
      %17 = vector.broadcast %cst_9 : f32 to vector<16x128xf32>
      %18 = arith.addf %17, %16 : vector<16x128xf32>
      %19 = arith.divf %17, %18 : vector<16x128xf32>
      %20 = vector.extract_strided_slice %13 {offsets = [0, 128], sizes = [16, 128], strides = [1, 1]} : vector<16x384xf32> to vector<16x128xf32>
      %21 = arith.negf %20 : vector<16x128xf32>
      %22 = math.exp %21 : vector<16x128xf32>
      %cst_10 = arith.constant 1.000000e+00 : f32
      %23 = vector.broadcast %cst_10 : f32 to vector<16x128xf32>
      %24 = arith.addf %23, %22 : vector<16x128xf32>
      %25 = arith.divf %23, %24 : vector<16x128xf32>
      %26 = vector.extract_strided_slice %13 {offsets = [0, 256], sizes = [16, 128], strides = [1, 1]} : vector<16x384xf32> to vector<16x128xf32>
      %27 = arith.mulf %19, %26 : vector<16x128xf32>
      %28 = math.tanh %27 : vector<16x128xf32>
      %c0_11 = arith.constant 0 : index
      %c0_12 = arith.constant 0 : index
      %29 = vector.load %arg2[%c0_11, %c0_12] : memref<16x128xf32, #tpu.memory_space<vmem>>, vector<16x128xf32>
      %30 = arith.subf %28, %29 : vector<16x128xf32>
      %31 = arith.mulf %25, %30 : vector<16x128xf32>
      %32 = arith.addf %29, %31 : vector<16x128xf32>
      %c0_13 = arith.constant 0 : index
      %c0_14 = arith.constant 0 : index
      %33 = vector.load %arg5[%c0_13, %c0_14] : memref<16x128xf32, #tpu.memory_space<vmem>>, vector<16x128xf32>
      tpu.vector_store %arg5[%c0_13, %c0_14], %32 {strides = array<i32>} : memref<16x128xf32, #tpu.memory_space<vmem>>, vector<16x128xf32>,
    } else {
    }
    return
  }
  func.func @transform_0(%arg0: i32, %arg1: i32) -> (i32, i32) {
    %c0_i32 = arith.constant 0 : i32
    %c0_i32_0 = arith.constant 0 : i32
    return %arg0, %c0_i32 : i32, i32
  }
  func.func @transform_1(%arg0: i32, %arg1: i32) -> (i32, i32) {
    %c0_i32 = arith.constant 0 : i32
    %c0_i32_0 = arith.constant 0 : i32
    return %c0_i32, %arg1 : i32, i32
  }
  func.func @transform_2(%arg0: i32, %arg1: i32) -> (i32, i32) {
    %c0_i32 = arith.constant 0 : i32
    %c0_i32_0 = arith.constant 0 : i32
    return %c0_i32, %arg1 : i32, i32
  }
  func.func @transform_3(%arg0: i32, %arg1: i32) -> (i32, i32) {
    %c0_i32 = arith.constant 0 : i32
    %c0_i32_0 = arith.constant 0 : i32
    return %arg0, %c0_i32 : i32, i32
  }
}

module attributes {stable_mosaic.version = 11 : i64} {
  func.func @_transition_gru_kernel(%arg0: i32, %arg1: i32, %arg2: memref<16x128xf32, #tpu.memory_space<vmem>>, %arg3: memref<128x384xf32, #tpu.memory_space<vmem>>, %arg4: memref<1x384xf32, #tpu.memory_space<vmem>>, %arg5: memref<16x128xf32, #tpu.memory_space<vmem>>, %arg6: memref<16x384xf32, #tpu.memory_space<vmem>>) attributes {dimension_semantics = [#tpu.dimension_semantics<parallel>, #tpu.dimension_semantics<arbitrary>], iteration_bounds = array<i64: 1, 1>, scalar_prefetch = 0 : i64, scratch_operands = 1 : i64, tpu.core_type = #tpu.core_type<tc>, window_params = [{transform_indices = @transform_0, window_bounds = array<i64: 16, 128>}, {transform_indices = @transform_1, window_bounds = array<i64: 128, 384>}, {transform_indices = @transform_2, window_bounds = array<i64: 1, 384>}, {transform_indices = @transform_3, window_bounds = array<i64: 16, 128>}]} {
    %c0 = arith.constant 0 : index
    %c0_0 = arith.constant 0 : index
    %0 = vector.load %arg2[%c0, %c0_0] : memref<16x128xf32, #tpu.memory_space<vmem>>, vector<16x128xf32>
    %c0_1 = arith.constant 0 : index
    %c0_2 = arith.constant 0 : index
    %1 = vector.load %arg3[%c0_1, %c0_2] : memref<128x384xf32, #tpu.memory_space<vmem>>, vector<128x384xf32>
    %cst = arith.constant dense<0.000000e+00> : vector<16x384xf32>
    %2 = tpu.matmul %0, %1, %cst {dimension_numbers = #tpu.dot_dimension_numbers<[1], [0], [0], [1], [0, 0, 1, 1], [], []>} : vector<16x128xf32>, vector<128x384xf32>, vector<16x384xf32> -> vector<16x384xf32>
    %c0_3 = arith.constant 0 : index
    %c0_4 = arith.constant 0 : index
    %3 = vector.load %arg4[%c0_3, %c0_4] : memref<1x384xf32, #tpu.memory_space<vmem>>, vector<1x384xf32>
    %4 = vector.broadcast %3 : vector<1x384xf32> to vector<16x384xf32>
    %5 = arith.addf %2, %4 : vector<16x384xf32>
    %c384_i32 = arith.constant 384 : i32
    %6 = arith.muli %arg1, %c384_i32 : i32
    %7 = tpu.assume_multiple %6, 128 : i32
    %c0_5 = arith.constant 0 : index
    %8 = arith.index_cast %7 : i32 to index
    %9 = vector.load %arg6[%c0_5, %8] : memref<16x384xf32, #tpu.memory_space<vmem>>, vector<16x384xf32>
    tpu.vector_store %arg6[%c0_5, %8], %5 {strides = array<i32>} : memref<16x384xf32, #tpu.memory_space<vmem>>, vector<16x384xf32>,
    %c0_i32 = arith.constant 0 : i32
    %10 = arith.cmpi eq, %arg1, %c0_i32 : i32
    %11 = arith.extui %10 : i1 to i32
    %c0_i32_6 = arith.constant 0 : i32
    %12 = arith.cmpi ne, %11, %c0_i32_6 : i32
    scf.if %12 {
      %c0_7 = arith.constant 0 : index
      %c0_8 = arith.constant 0 : index
      %13 = vector.load %arg6[%c0_7, %c0_8] : memref<16x384xf32, #tpu.memory_space<vmem>>, vector<16x384xf32>
      %14 = vector.extract_strided_slice %13 {offsets = [0, 0], sizes = [16, 128], strides = [1, 1]} : vector<16x384xf32> to vector<16x128xf32>
      %15 = arith.negf %14 : vector<16x128xf32>
      %16 = math.exp %15 : vector<16x128xf32>
      %cst_9 = arith.constant 1.000000e+00 : f32
      %17 = vector.broadcast %cst_9 : f32 to vector<16x128xf32>
      %18 = arith.addf %17, %16 : vector<16x128xf32>
      %19 = arith.divf %17, %18 : vector<16x128xf32>
      %20 = vector.extract_strided_slice %13 {offsets = [0, 128], sizes = [16, 128], strides = [1, 1]} : vector<16x384xf32> to vector<16x128xf32>
      %21 = arith.negf %20 : vector<16x128xf32>
      %22 = math.exp %21 : vector<16x128xf32>
      %cst_10 = arith.constant 1.000000e+00 : f32
      %23 = vector.broadcast %cst_10 : f32 to vector<16x128xf32>
      %24 = arith.addf %23, %22 : vector<16x128xf32>
      %25 = arith.divf %23, %24 : vector<16x128xf32>
      %26 = vector.extract_strided_slice %13 {offsets = [0, 256], sizes = [16, 128], strides = [1, 1]} : vector<16x384xf32> to vector<16x128xf32>
      %27 = arith.mulf %19, %26 : vector<16x128xf32>
      %28 = math.tanh %27 : vector<16x128xf32>
      %c0_11 = arith.constant 0 : index
      %c0_12 = arith.constant 0 : index
      %29 = vector.load %arg2[%c0_11, %c0_12] : memref<16x128xf32, #tpu.memory_space<vmem>>, vector<16x128xf32>
      %30 = arith.subf %28, %29 : vector<16x128xf32>
      %31 = arith.mulf %25, %30 : vector<16x128xf32>
      %32 = arith.addf %29, %31 : vector<16x128xf32>
      %c0_13 = arith.constant 0 : index
      %c0_14 = arith.constant 0 : index
      %33 = vector.load %arg5[%c0_13, %c0_14] : memref<16x128xf32, #tpu.memory_space<vmem>>, vector<16x128xf32>
      tpu.vector_store %arg5[%c0_13, %c0_14], %32 {strides = array<i32>} : memref<16x128xf32, #tpu.memory_space<vmem>>, vector<16x128xf32>,
    } else {
    }
    return
  }
  func.func @transform_0(%arg0: i32, %arg1: i32) -> (i32, i32) {
    %c0_i32 = arith.constant 0 : i32
    %c0_i32_0 = arith.constant 0 : i32
    return %arg0, %c0_i32 : i32, i32
  }
  func.func @transform_1(%arg0: i32, %arg1: i32) -> (i32, i32) {
    %c0_i32 = arith.constant 0 : i32
    %c0_i32_0 = arith.constant 0 : i32
    return %c0_i32, %arg1 : i32, i32
  }
  func.func @transform_2(%arg0: i32, %arg1: i32) -> (i32, i32) {
    %c0_i32 = arith.constant 0 : i32
    %c0_i32_0 = arith.constant 0 : i32
    return %c0_i32, %arg1 : i32, i32
  }
  func.func @transform_3(%arg0: i32, %arg1: i32) -> (i32, i32) {
    %c0_i32 = arith.constant 0 : i32
    %c0_i32_0 = arith.constant 0 : i32
    return %arg0, %c0_i32 : i32, i32
  }
}

</mosaic_0001>

<bundles_post_ra>
// kernel: tpu_custom_call.1
= control target key start
LH: loop header
LB: loop body
LE: loop exit
PB: predicated region body
PF: predicated region fallthrough
CT: control target
= control target key end

     0   :  { %8 = vsyncpa [#allocation4], 0  ;;  %s551_s0 = inlined_call_operand.hbm [shape: f32[16,128], index: 0, kind: input, shape index: {}]   ;;  %s552_s1 = inlined_call_operand.hbm [shape: f32[128,384], index: 1, kind: input, shape index: {}]   ;;  %s553_s2 = inlined_call_operand.hbm [shape: f32[1,384], index: 2, kind: input, shape index: {}]   ;;  %s554_s3 = inlined_call_operand.hbm [shape: f32[16,128], index: 3, kind: output, shape index: {}]  }
   0x1   :  { %9 = vsyncpa [#allocation7], 0  ;;  %s28_s14 = sshll.u32 %s552_s1, 4  ;;  %s29_s14 = int_to_ptr.hbm [resolvable:$true] %s28_s14 }
   0x2   :  { %10 = vsyncpa [#allocation5], 0  ;;  %s470_s15 = smov [#allocation6]   ;;  %s15_s19 = sshll.u32 %s551_s0, 4  ;;  %s16_s19 = int_to_ptr.hbm [resolvable:$true] %s15_s19 }
   0x3   :  { %s30_s16 = sshll.u32 %s470_s15, 4  ;;  %s471_s20 = smov 384   ;;  %s31_s16 = int_to_ptr.vmem [resolvable:$true] %s30_s16 }
   0x4   :  { %s472_s21 = smov 24   ;;  %s473_s22 = smov [#allocation3]  }
   0x5   :  { %36 = dma.hbm_to_vmem [thread:$0]  %s29_s14, 6144, %s31_s16, [#allocation7], %s471_s20, %s471_s20, %s472_s21  }
   0x6   :  { %s17_s23 = sshll.u32 %s473_s22, 4  ;;  %s474_s24 = smov 128   ;;  %s18_s23 = int_to_ptr.vmem [resolvable:$true] %s17_s23 }
   0x7   :  { %s475_s25 = smov 8   ;;  %s42_s27 = sshll.u32 %s553_s2, 4  ;;  %s43_s27 = int_to_ptr.hbm [resolvable:$true] %s42_s27 }
   0x8   :  { %23 = dma.hbm_to_vmem [thread:$0]  %s16_s19, 256, %s18_s23, [#allocation4], %s474_s24, %s474_s24, %s475_s25  }
   0x9   :  { %s476_s28 = smov [#allocation8]  }
   0xa   :  { %s44_s0 = sshll.u32 %s476_s28, 4  ;;  %s45_s0 = int_to_ptr.vmem [resolvable:$true] %s44_s0 }
   0xb   :  { %47 = dma.hbm_to_vmem [thread:$0]  %s43_s27, 48, %s45_s0, [#allocation7]  }
   0xc   :  { %464 = dma.done.wait [#allocation4], 256  }
   0xd   :  { %465 = vsyncadd [#allocation4], 4294967040 }
   0xe   :  { %466 = dma.done.wait [#allocation7], 6192  }
   0xf   :  { %467 = vsyncadd [#allocation7], 4294961104  ;;  %v107_v0 = vld [vmem:[#allocation6 + $0x168] sm:$0xff]  ;;  %v108_v1 = vld [vmem:[#allocation6 + $0x170] sm:$0xff]  ;;  %s477_s2 = smov [#allocation9]   ;;  %s304_s5 = sshll.u32 %s554_s3, 4  ;;  %s305_s5 = int_to_ptr.hbm [resolvable:$true] %s304_s5 }
  0x10   :  { %v104_v2 = vld [vmem:[#allocation6 + $0x150] sm:$0xff]  ;;  %118 = vmatpush.msra.mxu0 %v107_v0  ;;  %324 = vmatpush.msra.mxu3 %v107_v0  ;;  %v105_v3 = vld [vmem:[#allocation6 + $0x158] sm:$0xff]  ;;  %v102_v5 = vld [vmem:[#allocation6 + $0x140] sm:$0xff]  ;;  %s302_s29 = sshll.u32 %s477_s2, 4  ;;  %s303_s29 = int_to_ptr.vmem [resolvable:$true] %s302_s29 }
  0x11   :  { %141 = vmatpush.msra.mxu1 %v108_v1  ;;  %v101_v4 = vld [vmem:[#allocation6 + $0x138] sm:$0xff]  ;;  %v98_v6 = vld [vmem:[#allocation6 + $0x120] sm:$0xff]  ;;  %v99_v7 = vld [vmem:[#allocation6 + $0x128] sm:$0xff] }
  0x12   :  { %119 = vmatpush.msra.mxu0 %v104_v2  ;;  %325 = vmatpush.msra.mxu3 %v104_v2  ;;  %v95_v8 = vld [vmem:[#allocation6 + $0x108] sm:$0xff]  ;;  %v96_v9 = vld [vmem:[#allocation6 + $0x110] sm:$0xff]  ;;  %v109_v10 = vld [vmem:[#allocation6 + $0x178] sm:$0xff] }
  0x13   :  { %142 = vmatpush.msra.mxu1 %v105_v3  ;;  %v92_v11 = vld [vmem:[#allocation6 + $0xf0] sm:$0xff]  ;;  %164 = vmatpush.msra.mxu2 %v109_v10  ;;  %v106_v12 = vld [vmem:[#allocation6 + $0x160] sm:$0xff]  ;;  %v93_v13 = vld [vmem:[#allocation6 + $0xf8] sm:$0xff] }
  0x14   :  { %120 = vmatpush.msra.mxu0 %v101_v4  ;;  %326 = vmatpush.msra.mxu3 %v101_v4  ;;  %v103_v14 = vld [vmem:[#allocation6 + $0x148] sm:$0xff]  ;;  %v89_v15 = vld [vmem:[#allocation6 + $0xd8] sm:$0xff]  ;;  %v90_v16 = vld [vmem:[#allocation6 + $0xe0] sm:$0xff] }
  0x15   :  { %143 = vmatpush.msra.mxu1 %v102_v5  ;;  %165 = vmatpush.msra.mxu2 %v106_v12  ;;  %v100_v17 = vld [vmem:[#allocation6 + $0x130] sm:$0xff]  ;;  %v86_v18 = vld [vmem:[#allocation6 + $0xc0] sm:$0xff]  ;;  %v87_v19 = vld [vmem:[#allocation6 + $0xc8] sm:$0xff] }
  0x16   :  { %121 = vmatpush.msra.mxu0 %v98_v6  ;;  %327 = vmatpush.msra.mxu3 %v98_v6  ;;  %v97_v20 = vld [vmem:[#allocation6 + $0x118] sm:$0xff]  ;;  %v83_v21 = vld [vmem:[#allocation6 + $0xa8] sm:$0xff]  ;;  %v84_v22 = vld [vmem:[#allocation6 + $0xb0] sm:$0xff] }
  0x17   :  { %144 = vmatpush.msra.mxu1 %v99_v7  ;;  %166 = vmatpush.msra.mxu2 %v103_v14  ;;  %v94_v23 = vld [vmem:[#allocation6 + $0x100] sm:$0xff]  ;;  %v80_v24 = vld [vmem:[#allocation6 + $0x90] sm:$0xff]  ;;  %v81_v25 = vld [vmem:[#allocation6 + $0x98] sm:$0xff] }
  0x18   :  { %122 = vmatpush.msra.mxu0 %v95_v8  ;;  %328 = vmatpush.msra.mxu3 %v95_v8  ;;  %v91_v26 = vld [vmem:[#allocation6 + $0xe8] sm:$0xff]  ;;  %v77_v27 = vld [vmem:[#allocation6 + $0x78] sm:$0xff]  ;;  %v78_v28 = vld [vmem:[#allocation6 + $0x80] sm:$0xff] }
  0x19   :  { %145 = vmatpush.msra.mxu1 %v96_v9  ;;  %167 = vmatpush.msra.mxu2 %v100_v17  ;;  %v88_v29 = vld [vmem:[#allocation6 + $0xd0] sm:$0xff]  ;;  %v74_v30 = vld [vmem:[#allocation6 + $0x60] sm:$0xff]  ;;  %v75_v31 = vld [vmem:[#allocation6 + $0x68] sm:$0xff] }
  0x1a   :  { %123 = vmatpush.msra.mxu0 %v92_v11  ;;  %329 = vmatpush.msra.mxu3 %v92_v11  ;;  %v85_v32 = vld [vmem:[#allocation6 + $0xb8] sm:$0xff]  ;;  %v71_v33 = vld [vmem:[#allocation6 + $0x48] sm:$0xff]  ;;  %v72_v34 = vld [vmem:[#allocation6 + $0x50] sm:$0xff] }
  0x1b   :  { %146 = vmatpush.msra.mxu1 %v93_v13  ;;  %168 = vmatpush.msra.mxu2 %v97_v20  ;;  %v82_v35 = vld [vmem:[#allocation6 + $0xa0] sm:$0xff]  ;;  %v68_v36 = vld [vmem:[#allocation6 + $0x30] sm:$0xff]  ;;  %v69_v37 = vld [vmem:[#allocation6 + $0x38] sm:$0xff] }
  0x1c   :  { %124 = vmatpush.msra.mxu0 %v89_v15  ;;  %330 = vmatpush.msra.mxu3 %v89_v15  ;;  %v79_v38 = vld [vmem:[#allocation6 + $0x88] sm:$0xff]  ;;  %v65_v39 = vld [vmem:[#allocation6 + $0x18] sm:$0xff]  ;;  %v66_v40 = vld [vmem:[#allocation6 + $0x20] sm:$0xff] }
  0x1d   :  { %147 = vmatpush.msra.mxu1 %v90_v16  ;;  %169 = vmatpush.msra.mxu2 %v94_v23  ;;  %v76_v41 = vld [vmem:[#allocation6 + $0x70] sm:$0xff]  ;;  %v62_v42 = vld [vmem:[#allocation6] sm:$0xff]  ;;  %v63_v43 = vld [vmem:[#allocation6 + $0x8] sm:$0xff] }
  0x1e   :  { %125 = vmatpush.msra.mxu0 %v86_v18  ;;  %331 = vmatpush.msra.mxu3 %v86_v18  ;;  %v510_v44 = vld [vmem:[#allocation3] sm:$0xff]  ;;  %v512_v45 = vld [vmem:[#allocation3 + $0x8] sm:$0xff]  ;;  %v70_v47 = vld [vmem:[#allocation6 + $0x40] sm:$0xff] }
  0x1f   :  { %148 = vmatpush.msra.mxu1 %v87_v19  ;;  %170 = vmatpush.msra.mxu2 %v91_v26  ;;  %v73_v46 = vld [vmem:[#allocation6 + $0x58] sm:$0xff]  ;;  %v67_v48 = vld [vmem:[#allocation6 + $0x28] sm:$0xff]  ;;  %v64_v49 = vld [vmem:[#allocation6 + $0x10] sm:$0xff] }
  0x20   :  { %126 = vmatpush.msra.mxu0 %v83_v21  ;;  %332 = vmatpush.msra.mxu3 %v83_v21  ;;  %v520_v50 = vld [vmem:[#allocation8] sm:$0x7] }
  0x21   :  { %149 = vmatpush.msra.mxu1 %v84_v22  ;;  %171 = vmatpush.msra.mxu2 %v88_v29  ;;  %v112_v51 = vperm.slane %v520_v50, 0  ;;  %v113_v52 = vperm.slane %v520_v50, 1  ;;  %v114_v15 = vperm.slane %v520_v50, 2 }
  0x22   :  { %127 = vmatpush.msra.mxu0 %v80_v24  ;;  %333 = vmatpush.msra.mxu3 %v80_v24 }
  0x23   :  { %150 = vmatpush.msra.mxu1 %v81_v25  ;;  %172 = vmatpush.msra.mxu2 %v85_v32 }
  0x24   :  { %128 = vmatpush.msra.mxu0 %v77_v27  ;;  %334 = vmatpush.msra.mxu3 %v77_v27 }
  0x25   :  { %151 = vmatpush.msra.mxu1 %v78_v28  ;;  %173 = vmatpush.msra.mxu2 %v82_v35 }
  0x26   :  { %129 = vmatpush.msra.mxu0 %v74_v30  ;;  %335 = vmatpush.msra.mxu3 %v74_v30 }
  0x27   :  { %152 = vmatpush.msra.mxu1 %v75_v31  ;;  %174 = vmatpush.msra.mxu2 %v79_v38 }
  0x28   :  { %130 = vmatpush.msra.mxu0 %v71_v33  ;;  %336 = vmatpush.msra.mxu3 %v71_v33 }
  0x29   :  { %153 = vmatpush.msra.mxu1 %v72_v34  ;;  %175 = vmatpush.msra.mxu2 %v76_v41 }
  0x2a   :  { %131 = vmatpush.msra.mxu0 %v68_v36  ;;  %337 = vmatpush.msra.mxu3 %v68_v36 }
  0x2b   :  { %154 = vmatpush.msra.mxu1 %v69_v37  ;;  %176 = vmatpush.msra.mxu2 %v73_v46 }
  0x2c   :  { %132 = vmatpush.msra.mxu0 %v65_v39  ;;  %338 = vmatpush.msra.mxu3 %v65_v39 }
  0x2d   :  { %155 = vmatpush.msra.mxu1 %v66_v40  ;;  %177 = vmatpush.msra.mxu2 %v70_v47 }
  0x2e   :  { %133 = vmatpush.msra.mxu0 %v62_v42  ;;  %339 = vmatpush.msra.mxu3 %v62_v42 }
  0x2f   :  { %156 = vmatpush.msra.mxu1 %v63_v43  ;;  %134 = vmatmul.f32.vlgmr.msra.gmra.mxu0 %v510_v44 }
  0x30   :  { %137 = vmatmul.f32.vlgmr.msra.gmra.mxu3 %v512_v45  ;;  %157 = vmatmul.f32.vlgmr.msra.gmra.mxu1 %v510_v44 }
  0x31   :  { %178 = vmatpush.msra.mxu2 %v67_v48 }
  0x33   :  { %179 = vmatpush.msra.mxu2 %v64_v49 }
  0x34   :  { %180 = vmatmul.f32.vlgmr.msra.gmra.mxu2 %v510_v44 }
  0x38   :  { %160 = vmatmul.f32.gmra.mxu1 %v512_v45 }
  0x3c   :  { %183 = vmatmul.f32.gmra.mxu2 %v512_v45 }
  0xac   :  { %v135_v53 = vpop.f32.mrf.mxu0 }
  0xad   :  { %v136_v54 = vadd.f32 %v135_v53, %v112_v51  ;;  %v158_v55 = vpop.f32.mrf.mxu1 }
  0xae   :  { %v159_v56 = vadd.f32 %v158_v55, %v113_v52 }
  0xaf   :  { %v320_v57 = vmul.f32 -1.442695, %v136_v54 }
  0xb0   :  { %v322_v58 = vmul.f32 -1.442695, %v159_v56 }
  0xb1   :  { %348 = vpow2.f32 %v320_v57 }
  0xb2   :  { %350 = vpow2.f32 %v322_v58 }
  0xb3   :  { %v138_v59 = vpop.f32.mrf.mxu3 }
  0xb4   :  { %v139_v60 = vadd.f32 %v138_v59, %v112_v51 }
  0xb5   :  { %v161_v61 = vpop.f32.mrf.mxu1 }
  0xb6   :  { %v321_v62 = vmul.f32 -1.442695, %v139_v60  ;;  %v162_v63 = vadd.f32 %v161_v61, %v113_v52 }
  0xb7   :  { %v349_v0 = vpop.eup %348  ;;  %v181_v9 = vpop.f32.mrf.mxu2 }
  0xb8   :  { %v351_v1 = vpop.eup %350  ;;  %v214_v2 = vadd.f32 1.0, %v349_v0  ;;  %352 = vpow2.f32 %v321_v62  ;;  %v323_v3 = vmul.f32 -1.442695, %v162_v63  ;;  %v182_v24 = vadd.f32 %v181_v9, %v114_v15 }
  0xb9   :  { %v524_v4 = vadd.f32 1.0, %v351_v1 }
  0xba   :  { %354 = vrcp.f32 %v214_v2  ;;  %vm221_vm0 = vweird.f32 %v214_v2  ;;  %v227_v16 = vand.u32 2147483648, %v214_v2  ;;  %v225_v18 = vand.u32 2147483647, %v214_v2 }
  0xbb   :  { %356 = vrcp.f32 %v524_v4  ;;  %vm259_vm5 = vweird.f32 %v524_v4  ;;  %v265_v41 = vand.u32 2147483648, %v524_v4  ;;  %v263_v43 = vand.u32 2147483647, %v524_v4 }
  0xbc   :  { %358 = vpow2.f32 %v323_v3  ;;  %v228_v22 = vor.u32 1.1754944e-38, %v227_v16  ;;  %vm226_vm3 = vcmp.eq.f32.partialorder %v225_v18, 8.507059e+37 }
  0xbd   :  { %v266_v51 = vor.u32 1.1754944e-38, %v265_v41  ;;  %vm264_vm11 = vcmp.eq.f32.partialorder %v263_v43, 8.507059e+37 }
  0xbe   :  { %v353_v5 = vpop.eup %352 }
  0xbf   :  { %v215_v6 = vadd.f32 1.0, %v353_v5  ;;  %v184_v31 = vpop.f32.mrf.mxu2 }
  0xc0   :  { %v355_v7 = vpop.eup %354  ;;  %v185_v37 = vadd.f32 %v184_v31, %v114_v15 }
  0xc1   :  { %v357_v8 = vpop.eup %356  ;;  %360 = vrcp.f32 %v215_v6  ;;  %v217_v10 = vmul.f32 %v355_v7, %v214_v2  ;;  %vm222_vm1 = vweird.f32 %v355_v7  ;;  %v242_v32 = vand.u32 2147483648, %v215_v6 }
  0xc2   :  { %v359_v11 = vpop.eup %358  ;;  %v255_v12 = vmul.f32 %v357_v8, %v524_v4  ;;  %vm223_vm2 = vmor %vm221_vm0, %vm222_vm1  ;;  %v240_v35 = vand.u32 2147483647, %v215_v6  ;;  %vm236_vm6 = vweird.f32 %v215_v6  ;;  %vm260_vm7 = vweird.f32 %v357_v8 }
  0xc3   :  { %v528_v13 = vadd.f32 1.0, %v359_v11  ;;  %v218_v14 = vsub.f32 1.0, %v217_v10  ;;  %v243_v40 = vor.u32 1.1754944e-38, %v242_v32  ;;  %vm261_vm10 = vmor %vm259_vm5, %vm260_vm7 }
  0xc4   :  { %v256_v19 = vsub.f32 1.0, %v255_v12  ;;  %vm241_vm9 = vcmp.eq.f32.partialorder %v240_v35, 8.507059e+37 }
  0xc5   :  { %362 = vrcp.f32 %v528_v13  ;;  %v219_v17 = vmul.f32 %v355_v7, %v218_v14  ;;  %vm274_vm12 = vweird.f32 %v528_v13  ;;  %v280_v55 = vand.u32 2147483648, %v528_v13 }
  0xc6   :  { %v257_v26 = vmul.f32 %v357_v8, %v256_v19  ;;  %v278_v57 = vand.u32 2147483647, %v528_v13 }
  0xc7   :  { %v361_v20 = vpop.eup %360  ;;  %v220_v21 = vadd.f32 %v355_v7, %v219_v17  ;;  %v281_v61 = vor.u32 1.1754944e-38, %v280_v55 }
  0xc8   :  { %v232_v23 = vmul.f32 %v361_v20, %v215_v6  ;;  %vm237_vm4 = vweird.f32 %v361_v20  ;;  %v258_v39 = vadd.f32 %v357_v8, %v257_v26  ;;  %vm279_vm15 = vcmp.eq.f32.partialorder %v278_v57, 8.507059e+37 }
  0xc9   :  { %v224_v25 = vsel %vm223_vm2, %v355_v7, %v220_v21  ;;  %vm238_vm8 = vmor %vm236_vm6, %vm237_vm4 }
  0xca   :  { %v229_v27 = vsel %vm226_vm3, %v228_v22, %v224_v25  ;;  %v233_v28 = vsub.f32 1.0, %v232_v23  ;;  %v262_v49 = vsel %vm261_vm10, %v357_v8, %v258_v39 }
  0xcb   :  { %v363_v29 = vpop.eup %362  ;;  %v284_v30 = vmul.f32 %v229_v27, %v182_v24  ;;  %v267_v53 = vsel %vm264_vm11, %v266_v51, %v262_v49 }
  0xcc   :  { %v270_v33 = vmul.f32 %v363_v29, %v528_v13  ;;  %v234_v34 = vmul.f32 %v361_v20, %v233_v28  ;;  %vm275_vm13 = vweird.f32 %v363_v29 }
  0xcd   :  { %364 = vtanh.f32 %v284_v30  ;;  %vm276_vm14 = vmor %vm274_vm12, %vm275_vm13 }
  0xce   :  { %v271_v36 = vsub.f32 1.0, %v270_v33  ;;  %v235_v38 = vadd.f32 %v361_v20, %v234_v34 }
  0xd0   :  { %v239_v42 = vsel %vm238_vm8, %v361_v20, %v235_v38  ;;  %v272_v46 = vmul.f32 %v363_v29, %v271_v36 }
  0xd1   :  { %v244_v47 = vsel %vm241_vm9, %v243_v40, %v239_v42 }
  0xd2   :  { %v285_v48 = vmul.f32 %v244_v47, %v185_v37  ;;  %v273_v54 = vadd.f32 %v363_v29, %v272_v46 }
  0xd3   :  { %v365_v50 = vpop.eup %364 }
  0xd4   :  { %366 = vtanh.f32 %v285_v48  ;;  %v290_v52 = vsub.f32 %v365_v50, %v510_v44  ;;  %v277_v59 = vsel %vm276_vm14, %v363_v29, %v273_v54 }
  0xd5   :  { %v282_v63 = vsel %vm279_vm15, %v281_v61, %v277_v59 }
  0xd6   :  { %v292_v56 = vmul.f32 %v290_v52, %v267_v53 }
  0xd8   :  { %v294_v58 = vadd.f32 %v292_v56, %v510_v44 }
  0xda   :  { %v367_v60 = vpop.eup %366  ;;  %296 = vst [vmem:[#allocation9] sm:$0xff] %v294_v58 }
  0xdb   :  { %v291_v62 = vsub.f32 %v367_v60, %v512_v45 }
  0xdd   :  { %v293_v0 = vmul.f32 %v291_v62, %v282_v63 }
  0xdf   :  { %v295_v1 = vadd.f32 %v293_v0, %v512_v45 }
  0xe1   :  { %297 = vst [vmem:[#allocation9 + $0x8] sm:$0xff] %v295_v1 }
  0xe2   :  { %310 = dma.vmem_to_hbm [thread:$0]  %s303_s29, 256, %s305_s5, [#allocation5], %s474_s24, %s474_s24, %s475_s25  }
  0xe3   :  { %468 = dma.done.wait [#allocation5], 256  }
  0xe4   :  { %469 = vsyncadd [#allocation5], 4294967040 }
  0xe5   :  { %315 = vsyncpa [#allocation4], 1 }
  0xe6   :  { %316 = vsyncpa [#allocation7], 1 }
  0xe7   :  { %317 = vsyncpa [#allocation5], 1 }

// kernel: tpu_custom_call.1
= control target key start
LH: loop header
LB: loop body
LE: loop exit
PB: predicated region body
PF: predicated region fallthrough
CT: control target
= control target key end

     0   :  { %8 = vsyncpa [#allocation4], 0  ;;  %s551_s0 = inlined_call_operand.hbm [shape: f32[16,128], index: 0, kind: input, shape index: {}]   ;;  %s552_s1 = inlined_call_operand.hbm [shape: f32[128,384], index: 1, kind: input, shape index: {}]   ;;  %s553_s2 = inlined_call_operand.hbm [shape: f32[1,384], index: 2, kind: input, shape index: {}]   ;;  %s554_s3 = inlined_call_operand.hbm [shape: f32[16,128], index: 3, kind: output, shape index: {}]  }
   0x1   :  { %9 = vsyncpa [#allocation7], 0  ;;  %s28_s14 = sshll.u32 %s552_s1, 4  ;;  %s29_s14 = int_to_ptr.hbm [resolvable:$true] %s28_s14 }
   0x2   :  { %10 = vsyncpa [#allocation5], 0  ;;  %s470_s15 = smov [#allocation6]   ;;  %s15_s19 = sshll.u32 %s551_s0, 4  ;;  %s16_s19 = int_to_ptr.hbm [resolvable:$true] %s15_s19 }
   0x3   :  { %s30_s16 = sshll.u32 %s470_s15, 4  ;;  %s471_s20 = smov 384   ;;  %s31_s16 = int_to_ptr.vmem [resolvable:$true] %s30_s16 }
   0x4   :  { %s472_s21 = smov 24   ;;  %s473_s22 = smov [#allocation3]  }
   0x5   :  { %36 = dma.hbm_to_vmem [thread:$0]  %s29_s14, 6144, %s31_s16, [#allocation7], %s471_s20, %s471_s20, %s472_s21  }
   0x6   :  { %s17_s23 = sshll.u32 %s473_s22, 4  ;;  %s474_s24 = smov 128   ;;  %s18_s23 = int_to_ptr.vmem [resolvable:$true] %s17_s23 }
   0x7   :  { %s475_s25 = smov 8   ;;  %s42_s27 = sshll.u32 %s553_s2, 4  ;;  %s43_s27 = int_to_ptr.hbm [resolvable:$true] %s42_s27 }
   0x8   :  { %23 = dma.hbm_to_vmem [thread:$0]  %s16_s19, 256, %s18_s23, [#allocation4], %s474_s24, %s474_s24, %s475_s25  }
   0x9   :  { %s476_s28 = smov [#allocation8]  }
   0xa   :  { %s44_s0 = sshll.u32 %s476_s28, 4  ;;  %s45_s0 = int_to_ptr.vmem [resolvable:$true] %s44_s0 }
   0xb   :  { %47 = dma.hbm_to_vmem [thread:$0]  %s43_s27, 48, %s45_s0, [#allocation7]  }
   0xc   :  { %464 = dma.done.wait [#allocation4], 256  }
   0xd   :  { %465 = vsyncadd [#allocation4], 4294967040 }
   0xe   :  { %466 = dma.done.wait [#allocation7], 6192  }
   0xf   :  { %467 = vsyncadd [#allocation7], 4294961104  ;;  %v107_v0 = vld [vmem:[#allocation6 + $0x168] sm:$0xff]  ;;  %v108_v1 = vld [vmem:[#allocation6 + $0x170] sm:$0xff]  ;;  %s477_s2 = smov [#allocation9]   ;;  %s304_s5 = sshll.u32 %s554_s3, 4  ;;  %s305_s5 = int_to_ptr.hbm [resolvable:$true] %s304_s5 }
  0x10   :  { %v104_v2 = vld [vmem:[#allocation6 + $0x150] sm:$0xff]  ;;  %118 = vmatpush.msra.mxu0 %v107_v0  ;;  %324 = vmatpush.msra.mxu3 %v107_v0  ;;  %v105_v3 = vld [vmem:[#allocation6 + $0x158] sm:$0xff]  ;;  %v102_v5 = vld [vmem:[#allocation6 + $0x140] sm:$0xff]  ;;  %s302_s29 = sshll.u32 %s477_s2, 4  ;;  %s303_s29 = int_to_ptr.vmem [resolvable:$true] %s302_s29 }
  0x11   :  { %141 = vmatpush.msra.mxu1 %v108_v1  ;;  %v101_v4 = vld [vmem:[#allocation6 + $0x138] sm:$0xff]  ;;  %v98_v6 = vld [vmem:[#allocation6 + $0x120] sm:$0xff]  ;;  %v99_v7 = vld [vmem:[#allocation6 + $0x128] sm:$0xff] }
  0x12   :  { %119 = vmatpush.msra.mxu0 %v104_v2  ;;  %325 = vmatpush.msra.mxu3 %v104_v2  ;;  %v95_v8 = vld [vmem:[#allocation6 + $0x108] sm:$0xff]  ;;  %v96_v9 = vld [vmem:[#allocation6 + $0x110] sm:$0xff]  ;;  %v109_v10 = vld [vmem:[#allocation6 + $0x178] sm:$0xff] }
  0x13   :  { %142 = vmatpush.msra.mxu1 %v105_v3  ;;  %v92_v11 = vld [vmem:[#allocation6 + $0xf0] sm:$0xff]  ;;  %164 = vmatpush.msra.mxu2 %v109_v10  ;;  %v106_v12 = vld [vmem:[#allocation6 + $0x160] sm:$0xff]  ;;  %v93_v13 = vld [vmem:[#allocation6 + $0xf8] sm:$0xff] }
  0x14   :  { %120 = vmatpush.msra.mxu0 %v101_v4  ;;  %326 = vmatpush.msra.mxu3 %v101_v4  ;;  %v103_v14 = vld [vmem:[#allocation6 + $0x148] sm:$0xff]  ;;  %v89_v15 = vld [vmem:[#allocation6 + $0xd8] sm:$0xff]  ;;  %v90_v16 = vld [vmem:[#allocation6 + $0xe0] sm:$0xff] }
  0x15   :  { %143 = vmatpush.msra.mxu1 %v102_v5  ;;  %165 = vmatpush.msra.mxu2 %v106_v12  ;;  %v100_v17 = vld [vmem:[#allocation6 + $0x130] sm:$0xff]  ;;  %v86_v18 = vld [vmem:[#allocation6 + $0xc0] sm:$0xff]  ;;  %v87_v19 = vld [vmem:[#allocation6 + $0xc8] sm:$0xff] }
  0x16   :  { %121 = vmatpush.msra.mxu0 %v98_v6  ;;  %327 = vmatpush.msra.mxu3 %v98_v6  ;;  %v97_v20 = vld [vmem:[#allocation6 + $0x118] sm:$0xff]  ;;  %v83_v21 = vld [vmem:[#allocation6 + $0xa8] sm:$0xff]  ;;  %v84_v22 = vld [vmem:[#allocation6 + $0xb0] sm:$0xff] }
  0x17   :  { %144 = vmatpush.msra.mxu1 %v99_v7  ;;  %166 = vmatpush.msra.mxu2 %v103_v14  ;;  %v94_v23 = vld [vmem:[#allocation6 + $0x100] sm:$0xff]  ;;  %v80_v24 = vld [vmem:[#allocation6 + $0x90] sm:$0xff]  ;;  %v81_v25 = vld [vmem:[#allocation6 + $0x98] sm:$0xff] }
  0x18   :  { %122 = vmatpush.msra.mxu0 %v95_v8  ;;  %328 = vmatpush.msra.mxu3 %v95_v8  ;;  %v91_v26 = vld [vmem:[#allocation6 + $0xe8] sm:$0xff]  ;;  %v77_v27 = vld [vmem:[#allocation6 + $0x78] sm:$0xff]  ;;  %v78_v28 = vld [vmem:[#allocation6 + $0x80] sm:$0xff] }
  0x19   :  { %145 = vmatpush.msra.mxu1 %v96_v9  ;;  %167 = vmatpush.msra.mxu2 %v100_v17  ;;  %v88_v29 = vld [vmem:[#allocation6 + $0xd0] sm:$0xff]  ;;  %v74_v30 = vld [vmem:[#allocation6 + $0x60] sm:$0xff]  ;;  %v75_v31 = vld [vmem:[#allocation6 + $0x68] sm:$0xff] }
  0x1a   :  { %123 = vmatpush.msra.mxu0 %v92_v11  ;;  %329 = vmatpush.msra.mxu3 %v92_v11  ;;  %v85_v32 = vld [vmem:[#allocation6 + $0xb8] sm:$0xff]  ;;  %v71_v33 = vld [vmem:[#allocation6 + $0x48] sm:$0xff]  ;;  %v72_v34 = vld [vmem:[#allocation6 + $0x50] sm:$0xff] }
  0x1b   :  { %146 = vmatpush.msra.mxu1 %v93_v13  ;;  %168 = vmatpush.msra.mxu2 %v97_v20  ;;  %v82_v35 = vld [vmem:[#allocation6 + $0xa0] sm:$0xff]  ;;  %v68_v36 = vld [vmem:[#allocation6 + $0x30] sm:$0xff]  ;;  %v69_v37 = vld [vmem:[#allocation6 + $0x38] sm:$0xff] }
  0x1c   :  { %124 = vmatpush.msra.mxu0 %v89_v15  ;;  %330 = vmatpush.msra.mxu3 %v89_v15  ;;  %v79_v38 = vld [vmem:[#allocation6 + $0x88] sm:$0xff]  ;;  %v65_v39 = vld [vmem:[#allocation6 + $0x18] sm:$0xff]  ;;  %v66_v40 = vld [vmem:[#allocation6 + $0x20] sm:$0xff] }
  0x1d   :  { %147 = vmatpush.msra.mxu1 %v90_v16  ;;  %169 = vmatpush.msra.mxu2 %v94_v23  ;;  %v76_v41 = vld [vmem:[#allocation6 + $0x70] sm:$0xff]  ;;  %v62_v42 = vld [vmem:[#allocation6] sm:$0xff]  ;;  %v63_v43 = vld [vmem:[#allocation6 + $0x8] sm:$0xff] }
  0x1e   :  { %125 = vmatpush.msra.mxu0 %v86_v18  ;;  %331 = vmatpush.msra.mxu3 %v86_v18  ;;  %v510_v44 = vld [vmem:[#allocation3] sm:$0xff]  ;;  %v512_v45 = vld [vmem:[#allocation3 + $0x8] sm:$0xff]  ;;  %v70_v47 = vld [vmem:[#allocation6 + $0x40] sm:$0xff] }
  0x1f   :  { %148 = vmatpush.msra.mxu1 %v87_v19  ;;  %170 = vmatpush.msra.mxu2 %v91_v26  ;;  %v73_v46 = vld [vmem:[#allocation6 + $0x58] sm:$0xff]  ;;  %v67_v48 = vld [vmem:[#allocation6 + $0x28] sm:$0xff]  ;;  %v64_v49 = vld [vmem:[#allocation6 + $0x10] sm:$0xff] }
  0x20   :  { %126 = vmatpush.msra.mxu0 %v83_v21  ;;  %332 = vmatpush.msra.mxu3 %v83_v21  ;;  %v520_v50 = vld [vmem:[#allocation8] sm:$0x7] }
  0x21   :  { %149 = vmatpush.msra.mxu1 %v84_v22  ;;  %171 = vmatpush.msra.mxu2 %v88_v29  ;;  %v112_v51 = vperm.slane %v520_v50, 0  ;;  %v113_v52 = vperm.slane %v520_v50, 1  ;;  %v114_v15 = vperm.slane %v520_v50, 2 }
  0x22   :  { %127 = vmatpush.msra.mxu0 %v80_v24  ;;  %333 = vmatpush.msra.mxu3 %v80_v24 }
  0x23   :  { %150 = vmatpush.msra.mxu1 %v81_v25  ;;  %172 = vmatpush.msra.mxu2 %v85_v32 }
  0x24   :  { %128 = vmatpush.msra.mxu0 %v77_v27  ;;  %334 = vmatpush.msra.mxu3 %v77_v27 }
  0x25   :  { %151 = vmatpush.msra.mxu1 %v78_v28  ;;  %173 = vmatpush.msra.mxu2 %v82_v35 }
  0x26   :  { %129 = vmatpush.msra.mxu0 %v74_v30  ;;  %335 = vmatpush.msra.mxu3 %v74_v30 }
  0x27   :  { %152 = vmatpush.msra.mxu1 %v75_v31  ;;  %174 = vmatpush.msra.mxu2 %v79_v38 }
  0x28   :  { %130 = vmatpush.msra.mxu0 %v71_v33  ;;  %336 = vmatpush.msra.mxu3 %v71_v33 }
  0x29   :  { %153 = vmatpush.msra.mxu1 %v72_v34  ;;  %175 = vmatpush.msra.mxu2 %v76_v41 }
  0x2a   :  { %131 = vmatpush.msra.mxu0 %v68_v36  ;;  %337 = vmatpush.msra.mxu3 %v68_v36 }
  0x2b   :  { %154 = vmatpush.msra.mxu1 %v69_v37  ;;  %176 = vmatpush.msra.mxu2 %v73_v46 }
  0x2c   :  { %132 = vmatpush.msra.mxu0 %v65_v39  ;;  %338 = vmatpush.msra.mxu3 %v65_v39 }
  0x2d   :  { %155 = vmatpush.msra.mxu1 %v66_v40  ;;  %177 = vmatpush.msra.mxu2 %v70_v47 }
  0x2e   :  { %133 = vmatpush.msra.mxu0 %v62_v42  ;;  %339 = vmatpush.msra.mxu3 %v62_v42 }
  0x2f   :  { %156 = vmatpush.msra.mxu1 %v63_v43  ;;  %134 = vmatmul.f32.vlgmr.msra.gmra.mxu0 %v510_v44 }
  0x30   :  { %137 = vmatmul.f32.vlgmr.msra.gmra.mxu3 %v512_v45  ;;  %157 = vmatmul.f32.vlgmr.msra.gmra.mxu1 %v510_v44 }
  0x31   :  { %178 = vmatpush.msra.mxu2 %v67_v48 }
  0x33   :  { %179 = vmatpush.msra.mxu2 %v64_v49 }
  0x34   :  { %180 = vmatmul.f32.vlgmr.msra.gmra.mxu2 %v510_v44 }
  0x38   :  { %160 = vmatmul.f32.gmra.mxu1 %v512_v45 }
  0x3c   :  { %183 = vmatmul.f32.gmra.mxu2 %v512_v45 }
  0xac   :  { %v135_v53 = vpop.f32.mrf.mxu0 }
  0xad   :  { %v136_v54 = vadd.f32 %v135_v53, %v112_v51  ;;  %v158_v55 = vpop.f32.mrf.mxu1 }
  0xae   :  { %v159_v56 = vadd.f32 %v158_v55, %v113_v52 }
  0xaf   :  { %v320_v57 = vmul.f32 -1.442695, %v136_v54 }
  0xb0   :  { %v322_v58 = vmul.f32 -1.442695, %v159_v56 }
  0xb1   :  { %348 = vpow2.f32 %v320_v57 }
  0xb2   :  { %350 = vpow2.f32 %v322_v58 }
  0xb3   :  { %v138_v59 = vpop.f32.mrf.mxu3 }
  0xb4   :  { %v139_v60 = vadd.f32 %v138_v59, %v112_v51 }
  0xb5   :  { %v161_v61 = vpop.f32.mrf.mxu1 }
  0xb6   :  { %v321_v62 = vmul.f32 -1.442695, %v139_v60  ;;  %v162_v63 = vadd.f32 %v161_v61, %v113_v52 }
  0xb7   :  { %v349_v0 = vpop.eup %348  ;;  %v181_v9 = vpop.f32.mrf.mxu2 }
  0xb8   :  { %v351_v1 = vpop.eup %350  ;;  %v214_v2 = vadd.f32 1.0, %v349_v0  ;;  %352 = vpow2.f32 %v321_v62  ;;  %v323_v3 = vmul.f32 -1.442695, %v162_v63  ;;  %v182_v24 = vadd.f32 %v181_v9, %v114_v15 }
  0xb9   :  { %v524_v4 = vadd.f32 1.0, %v351_v1 }
  0xba   :  { %354 = vrcp.f32 %v214_v2  ;;  %vm221_vm0 = vweird.f32 %v214_v2  ;;  %v227_v16 = vand.u32 2147483648, %v214_v2  ;;  %v225_v18 = vand.u32 2147483647, %v214_v2 }
  0xbb   :  { %356 = vrcp.f32 %v524_v4  ;;  %vm259_vm5 = vweird.f32 %v524_v4  ;;  %v265_v41 = vand.u32 2147483648, %v524_v4  ;;  %v263_v43 = vand.u32 2147483647, %v524_v4 }
  0xbc   :  { %358 = vpow2.f32 %v323_v3  ;;  %v228_v22 = vor.u32 1.1754944e-38, %v227_v16  ;;  %vm226_vm3 = vcmp.eq.f32.partialorder %v225_v18, 8.507059e+37 }
  0xbd   :  { %v266_v51 = vor.u32 1.1754944e-38, %v265_v41  ;;  %vm264_vm11 = vcmp.eq.f32.partialorder %v263_v43, 8.507059e+37 }
  0xbe   :  { %v353_v5 = vpop.eup %352 }
  0xbf   :  { %v215_v6 = vadd.f32 1.0, %v353_v5  ;;  %v184_v31 = vpop.f32.mrf.mxu2 }
  0xc0   :  { %v355_v7 = vpop.eup %354  ;;  %v185_v37 = vadd.f32 %v184_v31, %v114_v15 }
  0xc1   :  { %v357_v8 = vpop.eup %356  ;;  %360 = vrcp.f32 %v215_v6  ;;  %v217_v10 = vmul.f32 %v355_v7, %v214_v2  ;;  %vm222_vm1 = vweird.f32 %v355_v7  ;;  %v242_v32 = vand.u32 2147483648, %v215_v6 }
  0xc2   :  { %v359_v11 = vpop.eup %358  ;;  %v255_v12 = vmul.f32 %v357_v8, %v524_v4  ;;  %vm223_vm2 = vmor %vm221_vm0, %vm222_vm1  ;;  %v240_v35 = vand.u32 2147483647, %v215_v6  ;;  %vm236_vm6 = vweird.f32 %v215_v6  ;;  %vm260_vm7 = vweird.f32 %v357_v8 }
  0xc3   :  { %v528_v13 = vadd.f32 1.0, %v359_v11  ;;  %v218_v14 = vsub.f32 1.0, %v217_v10  ;;  %v243_v40 = vor.u32 1.1754944e-38, %v242_v32  ;;  %vm261_vm10 = vmor %vm259_vm5, %vm260_vm7 }
  0xc4   :  { %v256_v19 = vsub.f32 1.0, %v255_v12  ;;  %vm241_vm9 = vcmp.eq.f32.partialorder %v240_v35, 8.507059e+37 }
  0xc5   :  { %362 = vrcp.f32 %v528_v13  ;;  %v219_v17 = vmul.f32 %v355_v7, %v218_v14  ;;  %vm274_vm12 = vweird.f32 %v528_v13  ;;  %v280_v55 = vand.u32 2147483648, %v528_v13 }
  0xc6   :  { %v257_v26 = vmul.f32 %v357_v8, %v256_v19  ;;  %v278_v57 = vand.u32 2147483647, %v528_v13 }
  0xc7   :  { %v361_v20 = vpop.eup %360  ;;  %v220_v21 = vadd.f32 %v355_v7, %v219_v17  ;;  %v281_v61 = vor.u32 1.1754944e-38, %v280_v55 }
  0xc8   :  { %v232_v23 = vmul.f32 %v361_v20, %v215_v6  ;;  %vm237_vm4 = vweird.f32 %v361_v20  ;;  %v258_v39 = vadd.f32 %v357_v8, %v257_v26  ;;  %vm279_vm15 = vcmp.eq.f32.partialorder %v278_v57, 8.507059e+37 }
  0xc9   :  { %v224_v25 = vsel %vm223_vm2, %v355_v7, %v220_v21  ;;  %vm238_vm8 = vmor %vm236_vm6, %vm237_vm4 }
  0xca   :  { %v229_v27 = vsel %vm226_vm3, %v228_v22, %v224_v25  ;;  %v233_v28 = vsub.f32 1.0, %v232_v23  ;;  %v262_v49 = vsel %vm261_vm10, %v357_v8, %v258_v39 }
  0xcb   :  { %v363_v29 = vpop.eup %362  ;;  %v284_v30 = vmul.f32 %v229_v27, %v182_v24  ;;  %v267_v53 = vsel %vm264_vm11, %v266_v51, %v262_v49 }
  0xcc   :  { %v270_v33 = vmul.f32 %v363_v29, %v528_v13  ;;  %v234_v34 = vmul.f32 %v361_v20, %v233_v28  ;;  %vm275_vm13 = vweird.f32 %v363_v29 }
  0xcd   :  { %364 = vtanh.f32 %v284_v30  ;;  %vm276_vm14 = vmor %vm274_vm12, %vm275_vm13 }
  0xce   :  { %v271_v36 = vsub.f32 1.0, %v270_v33  ;;  %v235_v38 = vadd.f32 %v361_v20, %v234_v34 }
  0xd0   :  { %v239_v42 = vsel %vm238_vm8, %v361_v20, %v235_v38  ;;  %v272_v46 = vmul.f32 %v363_v29, %v271_v36 }
  0xd1   :  { %v244_v47 = vsel %vm241_vm9, %v243_v40, %v239_v42 }
  0xd2   :  { %v285_v48 = vmul.f32 %v244_v47, %v185_v37  ;;  %v273_v54 = vadd.f32 %v363_v29, %v272_v46 }
  0xd3   :  { %v365_v50 = vpop.eup %364 }
  0xd4   :  { %366 = vtanh.f32 %v285_v48  ;;  %v290_v52 = vsub.f32 %v365_v50, %v510_v44  ;;  %v277_v59 = vsel %vm276_vm14, %v363_v29, %v273_v54 }
  0xd5   :  { %v282_v63 = vsel %vm279_vm15, %v281_v61, %v277_v59 }
  0xd6   :  { %v292_v56 = vmul.f32 %v290_v52, %v267_v53 }
  0xd8   :  { %v294_v58 = vadd.f32 %v292_v56, %v510_v44 }
  0xda   :  { %v367_v60 = vpop.eup %366  ;;  %296 = vst [vmem:[#allocation9] sm:$0xff] %v294_v58 }
  0xdb   :  { %v291_v62 = vsub.f32 %v367_v60, %v512_v45 }
  0xdd   :  { %v293_v0 = vmul.f32 %v291_v62, %v282_v63 }
  0xdf   :  { %v295_v1 = vadd.f32 %v293_v0, %v512_v45 }
  0xe1   :  { %297 = vst [vmem:[#allocation9 + $0x8] sm:$0xff] %v295_v1 }
  0xe2   :  { %310 = dma.vmem_to_hbm [thread:$0]  %s303_s29, 256, %s305_s5, [#allocation5], %s474_s24, %s474_s24, %s475_s25  }
  0xe3   :  { %468 = dma.done.wait [#allocation5], 256  }
  0xe4   :  { %469 = vsyncadd [#allocation5], 4294967040 }
  0xe5   :  { %315 = vsyncpa [#allocation4], 1 }
  0xe6   :  { %316 = vsyncpa [#allocation7], 1 }
  0xe7   :  { %317 = vsyncpa [#allocation5], 1 }

</bundles_post_ra>
